<compile_context>
chip_gen: v5e
topology: v5e:2x2
jax: 0.10.0
libtpu: 0.0.40
codegen_flags: <defaults>
</compile_context>

<pallas_src>
import functools

import numpy as np

import jax
import jax.numpy as jnp
from jax.experimental import pallas as pl
from jax.experimental.pallas import tpu as pltpu


def _mixed_pool_kernel(scal_ref, x_ref, pmax_ref, pavg_ref, o_ref, *, k, W, Lv):
    """One grid step = one tile of flattened N*C rows.

    scal_ref : (2,) f32 in SMEM      -- [alpha, (1 - alpha) / k^2]
    x_ref    : (nc_tile, H*W) VMEM   -- flattened input rows
    pmax_ref : (Lv, Ho*Wo) VMEM      -- one-hot window-origin selector
    pavg_ref : (H*W, Ho*Wo) VMEM     -- multi-hot window-membership selector
    o_ref    : (nc_tile, Ho*Wo)      -- lane-dense output block
    """
    xv = x_ref[...]                                   # native dtype (f32 / bf16)

    # Running window-max at every flat position p in [0, Lv); each window
    # offset (i, j) is a static contiguous lane slice of the flattened rows.
    # Non-window-origin positions mix elements across image rows, but the
    # one-hot selector below never picks those columns (VALID windows only),
    # so this is benign by construction.
    g_max = xv[:, 0:Lv]
    for i in range(k):
        for j in range(k):
            if i == 0 and j == 0:
                continue
            d = i * W + j
            g_max = jnp.maximum(g_max, xv[:, d:d + Lv])

    # Max branch: exact one-hot gather of the Ho*Wo window origins on the MXU
    # (selector entries are 0/1, f32 accumulation -> exact selection).
    mx = jnp.dot(g_max, pmax_ref[...], preferred_element_type=jnp.float32)
    # Avg branch: all window sums in one multi-hot selector matmul; the VPU
    # never touches a g_sum accumulator (store/XLU slot relief).
    sm = jnp.dot(xv, pavg_ref[...], preferred_element_type=jnp.float32)

    alpha = scal_ref[0]
    beta = scal_ref[1]                                # (1 - alpha) / k^2
    o_ref[...] = (alpha * mx + beta * sm).astype(o_ref.dtype)


def _pick_nc_tile(nc, row_bytes, itemsize, budget_bytes=2 << 20, min_steps=4):
    """Sublane-aligned row tile: <= ~2 MiB of input per step, and (when the
    N*C extent allows it) at least `min_steps` grid steps for megacore
    sharding and pipeline overlap."""
    sub = max(8, 32 // max(1, itemsize))              # 8 f32, 16 bf16, 32 int8
    cap = (budget_bytes // max(1, row_bytes)) // sub * sub
    cap = max(sub, cap)
    per_step = (((nc + min_steps - 1) // min_steps) // sub) * sub
    per_step = max(sub, per_step)
    return min(cap, per_step)


def mixed_pool(x, alpha, kernel_size, stride):
    """x: (N, C, H, W). alpha: (1,) f32 parameter. Returns (N, C, Ho, Wo)."""
    N, C, H, W = x.shape
    k, s = int(kernel_size), int(stride)
    Ho = (H - k) // s + 1
    Wo = (W - k) // s + 1
    NC, L, Q = N * C, H * W, Ho * Wo
    d_max = (k - 1) * W + (k - 1)       # largest in-window flat offset
    Lv = L - d_max                      # common length of the shifted slices

    # Compute dtype: keep bf16 native (bf16 VPU on v6e/v7x); otherwise f32.
    cdt = np.dtype(x.dtype)
    if cdt not in (np.dtype(jnp.float32), np.dtype(jnp.bfloat16)):
        cdt = np.dtype(jnp.float32)
    itemsize = cdt.itemsize

    # Zero-copy reshape to lane-dense rows (cast is a no-op for f32/bf16 x).
    xf = x.reshape(NC, L).astype(cdt)

    # ---- selectors (built once; tiny vs. x at these spatial sizes) --------
    q = jnp.arange(Q, dtype=jnp.int32)
    origin = (q // Wo) * (s * W) + (q % Wo) * s                 # window-origin flat idx
    # One-hot (Lv, Q): column q picks the window-origin position of output q.
    pmax = (jnp.arange(Lv, dtype=jnp.int32)[:, None] == origin[None, :]).astype(cdt)
    # Multi-hot (L, Q): column q has a 1 at every flat position inside window q.
    offs = (jnp.arange(k, dtype=jnp.int32)[:, None] * W
            + jnp.arange(k, dtype=jnp.int32)[None, :]).reshape(-1)   # (k*k,)
    members = origin[None, :] + offs[:, None]                        # (k*k, Q)
    pavg = jnp.zeros((L, Q), cdt).at[
        members, jnp.broadcast_to(q[None, :], members.shape)].set(1)

    alpha = jnp.asarray(alpha, dtype=jnp.float32).reshape((1,))
    scal = jnp.concatenate([alpha, (1.0 - alpha) / float(k * k)])    # (2,) SMEM scalars

    # ---- tiling & VMEM budget ---------------------------------------------
    nc_tile = _pick_nc_tile(NC, L * itemsize, itemsize)
    grid = (pl.cdiv(NC, nc_tile),)

    out_itemsize = np.dtype(x.dtype).itemsize
    vmem_est = (2 * nc_tile * L * itemsize          # double-buffered x blocks
                + 2 * nc_tile * Q * out_itemsize    # double-buffered out blocks
                + (Lv + L) * Q * itemsize           # single-buffered selectors
                + 6 * nc_tile * L * 4)              # in-kernel f32-ish temporaries
    vmem_limit = int(min(max(vmem_est + (4 << 20), 16 << 20), 64 << 20))

    kernel = functools.partial(_mixed_pool_kernel, k=k, W=W, Lv=Lv)

    out = pl.pallas_call(
        kernel,
        out_shape=jax.ShapeDtypeStruct((NC, Q), x.dtype),
        grid=grid,
        in_specs=[
            pl.BlockSpec(memory_space=pltpu.MemorySpace.SMEM),          # [alpha, beta]
            pl.BlockSpec((nc_tile, L), lambda n: (n, 0)),               # input rows
            pl.BlockSpec((Lv, Q), lambda n: (0, 0),
                         pipeline_mode=pl.Buffered(1)),                 # resident selector
            pl.BlockSpec((L, Q), lambda n: (0, 0),
                         pipeline_mode=pl.Buffered(1)),                 # resident selector
        ],
        out_specs=pl.BlockSpec((nc_tile, Q), lambda n: (n, 0)),
        compiler_params=pltpu.CompilerParams(
            dimension_semantics=("parallel",),
            vmem_limit_bytes=vmem_limit,
        ),
    )(scal, xf, pmax, pavg)

    return out.reshape(N, C, Ho, Wo)


def mixed_pool_reference(x, alpha, kernel_size, stride):
    """Pure-JAX reference matching PyTorch MaxPool2d/AvgPool2d (no padding)."""
    k, s = kernel_size, stride
    mx = jax.lax.reduce_window(
        x, -jnp.inf, jax.lax.max, (1, 1, k, k), (1, 1, s, s), "VALID"
    )
    av = jax.lax.reduce_window(
        x, 0.0, jax.lax.add, (1, 1, k, k), (1, 1, s, s), "VALID"
    ) / float(k * k)
    a = alpha[0]
    return a * mx + (1.0 - a) * av


if __name__ == "__main__":
    key = jax.random.PRNGKey(0)
    kx, ka = jax.random.split(key)

    N, C, H, W = 2, 4, 16, 16
    kernel_size, stride = 2, 2

    x = jax.random.normal(kx, (N, C, H, W), dtype=jnp.float32)
    # nn.init.uniform_(alpha, a=0.25, b=0.75), deterministic here
    alpha = jax.random.uniform(ka, (1,), dtype=jnp.float32, minval=0.25, maxval=0.75)

    out = mixed_pool(x, alpha, kernel_size, stride)
    out = jax.block_until_ready(out)

    ref = mixed_pool_reference(x, alpha, kernel_size, stride)
    Ho = (H - kernel_size) // stride + 1
    Wo = (W - kernel_size) // stride + 1
    assert out.shape == (N, C, Ho, Wo)
    assert jnp.allclose(out, ref, atol=1e-5, rtol=1e-5), "mismatch vs reference"

    print("KERNEL_OK")
</pallas_src>

<mosaic_0001>
module attributes {stable_mosaic.version = 11 : i64} {
  func.func @_mixed_pool_kernel(%arg0: i32, %arg1: memref<2xf32, #tpu.memory_space<smem>>, %arg2: memref<8x256xf32, #tpu.memory_space<vmem>>, %arg3: memref<239x64xf32, #tpu.memory_space<vmem>>, %arg4: memref<256x64xf32, #tpu.memory_space<vmem>>, %arg5: memref<8x64xf32, #tpu.memory_space<vmem>>) attributes {dimension_semantics = [#tpu.dimension_semantics<parallel>], iteration_bounds = array<i64: 1>, scalar_prefetch = 0 : i64, scratch_operands = 0 : i64, tpu.core_type = #tpu.core_type<tc>, window_params = [{transform_indices = @transform_0, window_bounds = array<i64: 2>}, {transform_indices = @transform_1, window_bounds = array<i64: 8, 256>}, {pipeline_mode = #tpu.pipeline_mode<synchronous>, transform_indices = @transform_2, window_bounds = array<i64: 239, 64>}, {pipeline_mode = #tpu.pipeline_mode<synchronous>, transform_indices = @transform_3, window_bounds = array<i64: 256, 64>}, {transform_indices = @transform_4, window_bounds = array<i64: 8, 64>}]} {
    %c0 = arith.constant 0 : index
    %c0_0 = arith.constant 0 : index
    %0 = vector.load %arg2[%c0, %c0_0] : memref<8x256xf32, #tpu.memory_space<vmem>>, vector<8x256xf32>
    %1 = vector.extract_strided_slice %0 {offsets = [0, 0], sizes = [8, 239], strides = [1, 1]} : vector<8x256xf32> to vector<8x239xf32>
    %2 = vector.extract_strided_slice %0 {offsets = [0, 1], sizes = [8, 239], strides = [1, 1]} : vector<8x256xf32> to vector<8x239xf32>
    %3 = arith.maximumf %1, %2 : vector<8x239xf32>
    %4 = vector.extract_strided_slice %0 {offsets = [0, 16], sizes = [8, 239], strides = [1, 1]} : vector<8x256xf32> to vector<8x239xf32>
    %5 = arith.maximumf %3, %4 : vector<8x239xf32>
    %6 = vector.extract_strided_slice %0 {offsets = [0, 17], sizes = [8, 239], strides = [1, 1]} : vector<8x256xf32> to vector<8x239xf32>
    %7 = arith.maximumf %5, %6 : vector<8x239xf32>
    %c0_1 = arith.constant 0 : index
    %c0_2 = arith.constant 0 : index
    %8 = vector.load %arg3[%c0_1, %c0_2] : memref<239x64xf32, #tpu.memory_space<vmem>>, vector<239x64xf32>
    %cst = arith.constant dense<0.000000e+00> : vector<8x64xf32>
    %9 = tpu.matmul %7, %8, %cst {dimension_numbers = #tpu.dot_dimension_numbers<[1], [0], [0], [1], [0, 0, 1, 1], [], []>} : vector<8x239xf32>, vector<239x64xf32>, vector<8x64xf32> -> vector<8x64xf32>
    %c0_3 = arith.constant 0 : index
    %c0_4 = arith.constant 0 : index
    %10 = vector.load %arg4[%c0_3, %c0_4] : memref<256x64xf32, #tpu.memory_space<vmem>>, vector<256x64xf32>
    %cst_5 = arith.constant dense<0.000000e+00> : vector<8x64xf32>
    %11 = tpu.matmul %0, %10, %cst_5 {dimension_numbers = #tpu.dot_dimension_numbers<[1], [0], [0], [1], [0, 0, 1, 1], [], []>} : vector<8x256xf32>, vector<256x64xf32>, vector<8x64xf32> -> vector<8x64xf32>
    %c0_6 = arith.constant 0 : index
    %12 = memref.load %arg1[%c0_6] : memref<2xf32, #tpu.memory_space<smem>>
    %c1 = arith.constant 1 : index
    %13 = memref.load %arg1[%c1] : memref<2xf32, #tpu.memory_space<smem>>
    %14 = vector.broadcast %12 : f32 to vector<8x64xf32>
    %15 = arith.mulf %14, %9 : vector<8x64xf32>
    %16 = vector.broadcast %13 : f32 to vector<8x64xf32>
    %17 = arith.mulf %16, %11 : vector<8x64xf32>
    %18 = arith.addf %15, %17 : vector<8x64xf32>
    %c0_7 = arith.constant 0 : index
    %c0_8 = arith.constant 0 : index
    %19 = vector.load %arg5[%c0_7, %c0_8] : memref<8x64xf32, #tpu.memory_space<vmem>>, vector<8x64xf32>
    tpu.vector_store %arg5[%c0_7, %c0_8], %18 {strides = array<i32>} : memref<8x64xf32, #tpu.memory_space<vmem>>, vector<8x64xf32>,
    return
  }
  func.func @transform_0(%arg0: i32) -> i32 {
    %c0_i32 = arith.constant 0 : i32
    %c0_i32_0 = arith.constant 0 : i32
    return %c0_i32 : i32
  }
  func.func @transform_1(%arg0: i32) -> (i32, i32) {
    %c0_i32 = arith.constant 0 : i32
    %c0_i32_0 = arith.constant 0 : i32
    return %arg0, %c0_i32 : i32, i32
  }
  func.func @transform_2(%arg0: i32) -> (i32, i32) {
    %c0_i32 = arith.constant 0 : i32
    %c0_i32_0 = arith.constant 0 : i32
    %c0_i32_1 = arith.constant 0 : i32
    return %c0_i32, %c0_i32_0 : i32, i32
  }
  func.func @transform_3(%arg0: i32) -> (i32, i32) {
    %c0_i32 = arith.constant 0 : i32
    %c0_i32_0 = arith.constant 0 : i32
    %c0_i32_1 = arith.constant 0 : i32
    return %c0_i32, %c0_i32_0 : i32, i32
  }
  func.func @transform_4(%arg0: i32) -> (i32, i32) {
    %c0_i32 = arith.constant 0 : i32
    %c0_i32_0 = arith.constant 0 : i32
    return %arg0, %c0_i32 : i32, i32
  }
}

</mosaic_0001>

<bundles_post_ra>
// kernel: tpu_custom_call.1
= control target key start
LH: loop header
LB: loop body
LE: loop exit
PB: predicated region body
PF: predicated region fallthrough
CT: control target
= control target key end

     0   :  { %9 = vsyncpa [#allocation4], 0  ;;  %s536_s0 = inlined_call_operand.vmem [shape: f32[2], index: 0, kind: input, shape index: {}]   ;;  %s537_s1 = inlined_call_operand.vmem [shape: f32[8,256], index: 1, kind: input, shape index: {}]   ;;  %s538_s2 = inlined_call_operand.vmem [shape: f32[239,64], index: 2, kind: input, shape index: {}]   ;;  %s539_s3 = inlined_call_operand.vmem [shape: f32[256,64], index: 3, kind: input, shape index: {}]   ;;  %s540_s4 = inlined_call_operand.hbm [shape: f32[8,64], index: 4, kind: output, shape index: {}]  }
   0x1   :  { %10 = vsyncpa [#allocation3], 0  ;;  %s16_s17 = sshll.u32 %s536_s0, 4  ;;  %s288_s18 = smov [#allocation2]   ;;  %s17_s17 = int_to_ptr.vmem [resolvable:$true] %s16_s17 }
   0x2   :  { %19 = dma.vmem_to_smem %s17_s17, 16, %s288_s18, [#allocation4]  }
   0x3   :  { %284 = dma.done.wait [#allocation4], 16  }
   0x4   :  { %285 = vsyncadd [#allocation4], 4294967280 }
   0x5   :  { %30 = sfence }
   0x6   :  { %v324_v0 = vld [vmem:[%s537_s1] sm:$0xff]  ;;  %v157_v1 = vld [vmem:[%s539_s3 + $0x78] sm:$0xff]  ;;  %s289_s23 = smov 112   ;;  %s290_s0 = smov 127   ;;  %v156_v3 = vld [vmem:[%s539_s3 + $0x70] sm:$0xff]  ;;  %vm98_vm0 = vcmask 1046528  }
   0x7   :  { %45 = vrot.lane.b32.xlu1 %v324_v0, %s289_s23  ;;  %35 = vrot.lane.b32.xlu0 %v324_v0, %s290_s0  ;;  %v173_v2 = vld [vmem:[%s539_s3 + $0xf8] sm:$0xff]  ;;  %s291_s28 = smov 111   ;;  %v172_v4 = vld [vmem:[%s539_s3 + $0xf0] sm:$0xff]  ;;  %vm39_vm1 = vcmask 1039360   ;;  %vm49_vm2 = vcmask 916480   ;;  %vm59_vm3 = vcmask 908288  }
   0x8   :  { %55 = vrot.lane.b32.xlu2 %v324_v0, %s291_s28  ;;  %174 = vmatpush.msra.mxu2 %v157_v1  ;;  %v155_v5 = vld [vmem:[%s539_s3 + $0x68] sm:$0xff]  ;;  %v80_v6 = vld [vmem:[%s538_s2 + $0x78] sm:$0xff]  ;;  %v79_v8 = vld [vmem:[%s538_s2 + $0x70] sm:$0xff]  ;;  %s214_s11 = sld [smem:[#allocation2]]  ;;  %s230_s15 = sshll.u32 %s540_s4, 4  ;;  %vm221_vm4 = vcmask 523264   ;;  %s231_s15 = int_to_ptr.hbm [resolvable:$true] %s230_s15 }
   0x9   :  { %194 = vmatpush.msra.mxu3 %v173_v2  ;;  %v171_v7 = vld [vmem:[%s539_s3 + $0xe8] sm:$0xff]  ;;  %102 = vmatpush.msra.mxu0 %v80_v6  ;;  %v154_v9 = vld [vmem:[%s539_s3 + $0x60] sm:$0xff]  ;;  %v153_v14 = vld [vmem:[%s539_s3 + $0x58] sm:$0xff] }
   0xa   :  { %175 = vmatpush.msra.mxu2 %v156_v3  ;;  %v94_v10 = vld [vmem:[%s538_s2 + $0xe8] sm:$0x7f]  ;;  %v170_v13 = vld [vmem:[%s539_s3 + $0xe0] sm:$0xff]  ;;  %v169_v16 = vld [vmem:[%s539_s3 + $0xd8] sm:$0xff] }
   0xb   :  { %195 = vmatpush.msra.mxu3 %v172_v4  ;;  %v78_v11 = vld [vmem:[%s538_s2 + $0x68] sm:$0xff]  ;;  %103 = vmatpush.msra.mxu0 %v79_v8  ;;  %v93_v15 = vld [vmem:[%s538_s2 + $0xe0] sm:$0xff]  ;;  %v152_v18 = vld [vmem:[%s539_s3 + $0x50] sm:$0xff] }
   0xc   :  { %v368_v12 = vld [vmem:[%s537_s1 + $0x8] sm:$0xff]  ;;  %176 = vmatpush.msra.mxu2 %v155_v5  ;;  %240 = vmatpush.msk.msra.mxu1 %vm98_vm0, %v94_v10  ;;  %v77_v17 = vld [vmem:[%s538_s2 + $0x60] sm:$0xff]  ;;  %v92_v19 = vld [vmem:[%s538_s2 + $0xd8] sm:$0xff] }
   0xd   :  { %196 = vmatpush.msra.mxu3 %v171_v7  ;;  %104 = vmatpush.msra.mxu0 %v78_v11  ;;  %v168_v20 = vld [vmem:[%s539_s3 + $0xd0] sm:$0xff]  ;;  %v76_v21 = vld [vmem:[%s538_s2 + $0x58] sm:$0xff]  ;;  %v151_v22 = vld [vmem:[%s539_s3 + $0x48] sm:$0xff] }
   0xe   :  { %177 = vmatpush.msra.mxu2 %v154_v9  ;;  %125 = vmatpush.msra.mxu1 %v93_v15  ;;  %v91_v23 = vld [vmem:[%s538_s2 + $0xd0] sm:$0xff]  ;;  %v167_v24 = vld [vmem:[%s539_s3 + $0xc8] sm:$0xff]  ;;  %v150_v26 = vld [vmem:[%s539_s3 + $0x40] sm:$0xff] }
   0xf   :  { %47 = vrot.lane.b32.xlu1 %v368_v12, %s289_s23  ;;  %37 = vrot.lane.b32.xlu0 %v368_v12, %s290_s0  ;;  %v75_v25 = vld [vmem:[%s538_s2 + $0x50] sm:$0xff]  ;;  %v90_v27 = vld [vmem:[%s538_s2 + $0xc8] sm:$0xff] }
  0x10   :  { %57 = vrot.lane.b32.xlu2 %v368_v12, %s291_s28  ;;  %197 = vmatpush.msra.mxu3 %v170_v13  ;;  %v166_v28 = vld [vmem:[%s539_s3 + $0xc0] sm:$0xff]  ;;  %v149_v29 = vld [vmem:[%s539_s3 + $0x38] sm:$0xff]  ;;  %v74_v31 = vld [vmem:[%s538_s2 + $0x48] sm:$0xff]  ;;  %s292_s28 = smov [#allocation5]  }
  0x11   :  { %178 = vmatpush.msra.mxu2 %v153_v14  ;;  %105 = vmatpush.msra.mxu0 %v77_v17  ;;  %v165_v30 = vld [vmem:[%s539_s3 + $0xb8] sm:$0xff]  ;;  %v148_v32 = vld [vmem:[%s539_s3 + $0x30] sm:$0xff]  ;;  %v89_v34 = vld [vmem:[%s538_s2 + $0xc0] sm:$0xff]  ;;  %s228_s12 = sshll.u32 %s292_s28, 4  ;;  %s229_s12 = int_to_ptr.vmem [resolvable:$true] %s228_s12 }
  0x12   :  { %198 = vmatpush.msra.mxu3 %v169_v16  ;;  %126 = vmatpush.msra.mxu1 %v92_v19  ;;  %v164_v33 = vld [vmem:[%s539_s3 + $0xb0] sm:$0xff]  ;;  %v73_v35 = vld [vmem:[%s538_s2 + $0x40] sm:$0xff]  ;;  %v147_v36 = vld [vmem:[%s539_s3 + $0x28] sm:$0xff] }
  0x13   :  { %179 = vmatpush.msra.mxu2 %v152_v18  ;;  %106 = vmatpush.msra.mxu0 %v76_v21  ;;  %v163_v37 = vld [vmem:[%s539_s3 + $0xa8] sm:$0xff]  ;;  %v88_v38 = vld [vmem:[%s538_s2 + $0xb8] sm:$0xff]  ;;  %v146_v40 = vld [vmem:[%s539_s3 + $0x20] sm:$0xff] }
  0x14   :  { %199 = vmatpush.msra.mxu3 %v168_v20  ;;  %127 = vmatpush.msra.mxu1 %v91_v23  ;;  %v72_v39 = vld [vmem:[%s538_s2 + $0x38] sm:$0xff]  ;;  %v162_v41 = vld [vmem:[%s539_s3 + $0xa0] sm:$0xff]  ;;  %v87_v42 = vld [vmem:[%s538_s2 + $0xb0] sm:$0xff] }
  0x15   :  { %180 = vmatpush.msra.mxu2 %v151_v22  ;;  %107 = vmatpush.msra.mxu0 %v75_v25  ;;  %v71_v43 = vld [vmem:[%s538_s2 + $0x30] sm:$0xff]  ;;  %v145_v44 = vld [vmem:[%s539_s3 + $0x18] sm:$0xff]  ;;  %v86_v46 = vld [vmem:[%s538_s2 + $0xa8] sm:$0xff]  ;;  %v216_v22 = vstv %s214_s11 }
  0x16   :  { %200 = vmatpush.msra.mxu3 %v167_v24  ;;  %128 = vmatpush.msra.mxu1 %v90_v27  ;;  %v161_v45 = vld [vmem:[%s539_s3 + $0x98] sm:$0xff]  ;;  %v70_v47 = vld [vmem:[%s538_s2 + $0x28] sm:$0xff]  ;;  %v144_v48 = vld [vmem:[%s539_s3 + $0x10] sm:$0xff] }
  0x17   :  { %181 = vmatpush.msra.mxu2 %v150_v26  ;;  %108 = vmatpush.msra.mxu0 %v74_v31  ;;  %v160_v49 = vld [vmem:[%s539_s3 + $0x90] sm:$0xff]  ;;  %v85_v50 = vld [vmem:[%s538_s2 + $0xa0] sm:$0xff]  ;;  %v143_v52 = vld [vmem:[%s539_s3 + $0x8] sm:$0xff] }
  0x18   :  { %201 = vmatpush.msra.mxu3 %v166_v28  ;;  %129 = vmatpush.msra.mxu1 %v89_v34  ;;  %v69_v51 = vld [vmem:[%s538_s2 + $0x20] sm:$0xff]  ;;  %v159_v53 = vld [vmem:[%s539_s3 + $0x88] sm:$0xff]  ;;  %v84_v54 = vld [vmem:[%s538_s2 + $0x98] sm:$0xff] }
  0x19   :  { %182 = vmatpush.msra.mxu2 %v149_v29  ;;  %109 = vmatpush.msra.mxu0 %v73_v35  ;;  %v68_v55 = vld [vmem:[%s538_s2 + $0x18] sm:$0xff]  ;;  %v142_v56 = vld [vmem:[%s539_s3] sm:$0xff]  ;;  %v83_v58 = vld [vmem:[%s538_s2 + $0x90] sm:$0xff] }
  0x1a   :  { %202 = vmatpush.msra.mxu3 %v165_v30  ;;  %130 = vmatpush.msra.mxu1 %v88_v38  ;;  %v158_v57 = vld [vmem:[%s539_s3 + $0x80] sm:$0xff]  ;;  %v67_v59 = vld [vmem:[%s538_s2 + $0x10] sm:$0xff]  ;;  %v82_v60 = vld [vmem:[%s538_s2 + $0x88] sm:$0xff] }
  0x1b   :  { %183 = vmatpush.msra.mxu2 %v148_v32  ;;  %110 = vmatpush.msra.mxu0 %v72_v39  ;;  %v66_v61 = vld [vmem:[%s538_s2 + $0x8] sm:$0xff]  ;;  %v81_v62 = vld [vmem:[%s538_s2 + $0x80] sm:$0xff] }
  0x1c   :  { %203 = vmatpush.msra.mxu3 %v164_v33  ;;  %131 = vmatpush.msra.mxu1 %v87_v42  ;;  %v65_v63 = vld [vmem:[%s538_s2] sm:$0xff]  ;;  %s242_s2 = sld [smem:[#allocation2 + $0x1]] }
  0x1d   :  { %184 = vmatpush.msra.mxu2 %v147_v36  ;;  %111 = vmatpush.msra.mxu0 %v71_v43 }
  0x1e   :  { %204 = vmatpush.msra.mxu3 %v163_v37  ;;  %132 = vmatpush.msra.mxu1 %v86_v46 }
  0x1f   :  { %185 = vmatpush.msra.mxu2 %v146_v40  ;;  %112 = vmatpush.msra.mxu0 %v70_v47 }
  0x20   :  { %205 = vmatpush.msra.mxu3 %v162_v41  ;;  %133 = vmatpush.msra.mxu1 %v85_v50 }
  0x21   :  { %186 = vmatpush.msra.mxu2 %v145_v44  ;;  %113 = vmatpush.msra.mxu0 %v69_v51 }
  0x22   :  { %206 = vmatpush.msra.mxu3 %v161_v45  ;;  %134 = vmatpush.msra.mxu1 %v84_v54  ;;  %v218_v20 = vstv %s242_s2 }
  0x23   :  { %187 = vmatpush.msra.mxu2 %v144_v48  ;;  %114 = vmatpush.msra.mxu0 %v68_v55 }
  0x24   :  { %207 = vmatpush.msra.mxu3 %v160_v49  ;;  %135 = vmatpush.msra.mxu1 %v83_v58 }
  0x25   :  { %188 = vmatpush.msra.mxu2 %v143_v52  ;;  %115 = vmatpush.msra.mxu0 %v67_v59 }
  0x26   :  { %208 = vmatpush.msra.mxu3 %v159_v53  ;;  %136 = vmatpush.msra.mxu1 %v82_v60 }
  0x27   :  { %189 = vmatpush.msra.mxu2 %v142_v56  ;;  %116 = vmatpush.msra.mxu0 %v66_v61 }
  0x28   :  { %209 = vmatpush.msra.mxu3 %v158_v57  ;;  %190 = vmatmul.f32.vlgmr.msra.gmra.mxu2 %v324_v0 }
  0x29   :  { %210 = vmatmul.f32.vlgmr.msra.gmra.mxu3 %v368_v12  ;;  %137 = vmatpush.msra.mxu1 %v81_v62 }
  0x2a   :  { %117 = vmatpush.msra.mxu0 %v65_v63 }
  0x62   :  { %v56_v1 = vpop.permute.xlu2 %55 }
  0x6a   :  { %v58_v8 = vpop.permute.xlu2 %57 }
  0x6b   :  { %v60_v14 = vsel %vm59_vm3, %v56_v1, %v58_v8 }
  0x79   :  { %v46_v2 = vpop.permute.xlu1 %45  ;;  %v36_v3 = vpop.permute.xlu0 %35 }
  0x81   :  { %v48_v4 = vpop.permute.xlu1 %47  ;;  %v38_v5 = vpop.permute.xlu0 %37 }
  0x82   :  { %v40_v6 = vsel %vm39_vm1, %v36_v3, %v38_v5  ;;  %v44_v7 = vmax.f32 %v368_v12, %v38_v5  ;;  %v50_v10 = vsel %vm49_vm2, %v46_v2, %v48_v4 }
  0x83   :  { %v43_v9 = vmax.f32 %v324_v0, %v40_v6 }
  0x84   :  { %v54_v11 = vmax.f32 %v44_v7, %v48_v4 }
  0x85   :  { %v53_v13 = vmax.f32 %v43_v9, %v50_v10 }
  0x86   :  { %v64_v15 = vmax.f32 %v54_v11, %v58_v8 }
  0x87   :  { %v63_v16 = vmax.f32 %v53_v13, %v60_v14 }
  0x88   :  { %241 = vmatmul.msk.f32.vlgmr.msra.gmra.mxu1 %vm59_vm3, %v64_v15 }
  0x89   :  { %118 = vmatmul.f32.vlgmr.msra.gmra.mxu0 %v63_v16 }
  0xab   :  { %v191_v17 = vpop.f32.mrf.mxu2 }
  0xac   :  { %v211_v18 = vpop.f32.mrf.mxu3 }
  0xad   :  { %v212_v19 = vadd.f32 %v211_v18, %v191_v17 }
  0xaf   :  { %v219_v24 = vmul.f32 %v218_v20, %v212_v19 }
 0x105   :  { %v139_v21 = vpop.f32.mrf.mxu1 }
 0x106   :  { %v119_v12 = vpop.f32.mrf.mxu0 }
 0x107   :  { %v140_v23 = vadd.f32 %v139_v21, %v119_v12 }
 0x109   :  { %v217_v0 = vmul.f32 %v216_v22, %v140_v23 }
 0x10b   :  { %v220_v25 = vadd.f32 %v219_v24, %v217_v0 }
 0x10d   :  { %222 = vst.msk [vmem:[#allocation5] sm:$0xff] %vm221_vm4, %v220_v25 }
 0x10e   :  { %233 = dma.vmem_to_hbm [thread:$0]  %s229_s12, 128, %s231_s15, [#allocation3]  }
 0x10f   :  { %286 = dma.done.wait [#allocation3], 128  }
 0x110   :  { %287 = vsyncadd [#allocation3], 4294967168 }
 0x111   :  { %238 = vsyncpa [#allocation3], 1 }
 0x112   :  { %239 = vsyncpa [#allocation4], 1 }

</bundles_post_ra>
